<compile_context>
chip_gen: v6e
topology: v6e:2x2x1
jax: 0.10.0
libtpu: 0.0.40
codegen_flags: <defaults>
</compile_context>

<pallas_src>
from functools import lru_cache, partial

import jax
import jax.numpy as jnp
from jax import lax
from jax.experimental import pallas as pl
from jax.experimental.pallas import tpu as pltpu


def _round_up(x: int, m: int) -> int:
    return ((x + m - 1) // m) * m


@lru_cache(maxsize=None)
def _device_kind() -> str:
    try:
        return jax.devices()[0].device_kind.lower()
    except Exception:
        return ""


@lru_cache(maxsize=None)
def _vmem_limit_bytes():
    """~75% of this generation's physical VMEM per TensorCore (None = default)."""
    try:
        cap = getattr(pltpu.get_tpu_info(), "vmem_capacity_bytes", None)
        if cap:
            return int(cap) * 3 // 4
    except Exception:
        pass
    kind = _device_kind()
    if "v7" in kind:
        return 48 * 1024 * 1024                 # 64 MiB physical per TC on v7x
    if any(g in kind for g in ("v4", "v5", "v6")):
        return 96 * 1024 * 1024                 # 128 MiB physical
    return None                                 # unknown chip: compiler default


@lru_cache(maxsize=None)
def _feature_align() -> int:
    """256 on v6e/v7x (256x256 MXU), 128 on v5e (4x128^2 MXU)."""
    kind = _device_kind()
    return 256 if ("v6" in kind or "v7" in kind) else 128


def _round_feat(d: int, align: int) -> int:
    return 128 if d <= 128 else _round_up(d, align)


def _weight_spec(shape, index_map, single_buffer):
    """Constant-index (VMEM-resident) block: single-buffer to halve footprint."""
    if single_buffer and hasattr(pl, "Buffered"):
        try:
            return pl.BlockSpec(shape, index_map, pipeline_mode=pl.Buffered(1))
        except TypeError:                       # BlockSpec without pipeline_mode
            pass
    return pl.BlockSpec(shape, index_map)


# ----------------------------------------------------------------- kernels

def mlp_kernel(x_ref, w1_ref, b1_ref, w2_ref, b2_ref, o_ref):
    """Single-shot fused fc1 -> ReLU -> fc2 (whole hidden dim at once)."""
    h = jnp.dot(x_ref[...], w1_ref[...], preferred_element_type=jnp.float32)
    h = jnp.maximum(h + b1_ref[...], 0.0)
    out = jnp.dot(h.astype(w2_ref.dtype), w2_ref[...],
                  preferred_element_type=jnp.float32)
    o_ref[...] = (out + b2_ref[...]).astype(o_ref.dtype)


def mlp_kernel_hchunk(x_ref, w1_ref, b1_ref, w2_ref, b2_ref, o_ref, acc_ref, *,
                      h_chunk):
    """Same math, hidden dim processed in `h_chunk` slices; fc2 accumulated
    into a (tb, tn) f32 VMEM scratch -> bounds the hidden intermediate."""
    n_chunks = w1_ref.shape[1] // h_chunk
    acc_ref[...] = jnp.zeros_like(acc_ref)

    def body(c, carry):
        h0 = pl.multiple_of(c * h_chunk, h_chunk)
        h = jnp.dot(x_ref[...], w1_ref[:, pl.ds(h0, h_chunk)],
                    preferred_element_type=jnp.float32)
        h = jnp.maximum(h + b1_ref[:, pl.ds(h0, h_chunk)], 0.0)
        acc_ref[...] += jnp.dot(h.astype(w2_ref.dtype),
                                w2_ref[pl.ds(h0, h_chunk), :],
                                preferred_element_type=jnp.float32)
        return carry

    lax.fori_loop(0, n_chunks, body, 0)
    o_ref[...] = (acc_ref[...] + b2_ref[...]).astype(o_ref.dtype)


# ----------------------------------------------------------------- wrapper

def prepare_params(w1, b1, w2, b2, *, compute_dtype=jnp.bfloat16):
    """One-time pad (MXU-aligned feature dims) + cast of the parameters.
    Hoisted out of the per-call forward so weights cross HBM only once."""
    In, H = w1.shape
    _, C = w2.shape
    align = _feature_align()
    In_p = _round_feat(In, align)
    H_p = _round_feat(H, align)
    C_p = _round_feat(C, align)
    w1_p = jnp.zeros((In_p, H_p), compute_dtype).at[:In, :H].set(
        w1.astype(compute_dtype))
    b1_p = jnp.zeros((1, H_p), jnp.float32).at[0, :H].set(b1.astype(jnp.float32))
    w2_p = jnp.zeros((H_p, C_p), compute_dtype).at[:H, :C].set(
        w2.astype(compute_dtype))
    b2_p = jnp.zeros((1, C_p), jnp.float32).at[0, :C].set(b2.astype(jnp.float32))
    return w1_p, b1_p, w2_p, b2_p


@partial(jax.jit, static_argnames=("num_classes", "tile_b", "h_chunk", "max_tn",
                                   "out_dtype", "single_buffer_weights"))
def simple_nn_forward(x, w1_p, b1_p, w2_p, b2_p, *, num_classes, tile_b=None,
                      h_chunk=None, max_tn=None, out_dtype=None,
                      single_buffer_weights=True):
    """x: [B, In] -> [B, num_classes].  Padded params from prepare_params()."""
    B, In = x.shape
    In_p, H_p = w1_p.shape
    C_p = w2_p.shape[1]
    C = num_classes
    compute_dtype = w1_p.dtype
    out_dtype = x.dtype if out_dtype is None else out_dtype
    itemsize = jnp.dtype(compute_dtype).itemsize

    vmem_limit = _vmem_limit_bytes()
    budget = (vmem_limit or 48 * 1024 * 1024) // 3      # VMEM share for weights

    # Batch tiling: keep >= 2 tiles whenever B allows so megacore chips can
    # shard the "parallel" batch axis across both TensorCores.
    if tile_b is None:
        tile_b = 1024 if (vmem_limit or 0) >= 80 * 1024 * 1024 else 512
    tb = min(tile_b, _round_up(B, 8))
    if B >= 16 and _round_up(B, tb) // tb < 2:
        tb = _round_up((B + 1) // 2, 8)
    B_p = _round_up(B, tb)

    # fc2 class-tiling fallback: largest multiple-of-128 divisor of C_p whose
    # resident weights fit the budget (tn == C_p in the common small case).
    cap = C_p if max_tn is None else max(128, _round_up(max_tn, 128))
    tn, d = 128, 128
    while d <= C_p:
        if C_p % d == 0 and d <= cap and (In_p * H_p + H_p * d) * itemsize <= budget:
            tn = d
        d += 128
    n_ctiles = C_p // tn
    # TODO(synk): if In_p*H_p alone exceeds the VMEM budget, w1 would also need
    # streaming (extra hidden grid axis); not needed at this module's sizes.

    # Hidden chunking: bound the (tb, H_p) f32 intermediate for large H.
    if h_chunk is None:
        if tb * H_p * 4 > 4 * 1024 * 1024:
            h_chunk = next(c for c in (512, 256, 128) if H_p % c == 0)
        else:
            h_chunk = 0
    use_chunked = 0 < h_chunk < H_p and H_p % h_chunk == 0

    # Activations: pad only when required; the cast halves inbound DMA bytes.
    if B_p == B and In_p == In:
        x_p = x.astype(compute_dtype)
    else:
        x_p = jnp.zeros((B_p, In_p), compute_dtype).at[:B, :In].set(
            x.astype(compute_dtype))

    try:
        cost = pl.CostEstimate(
            flops=2 * B_p * (In_p * H_p * n_ctiles + H_p * C_p),
            transcendentals=0,
            bytes_accessed=(B_p * In_p * itemsize
                            + (In_p * H_p + H_p * C_p) * itemsize
                            + (H_p + C_p) * 4
                            + B_p * C_p * jnp.dtype(out_dtype).itemsize))
    except Exception:
        cost = None

    resident_w2 = single_buffer_weights and n_ctiles == 1
    in_specs = [
        pl.BlockSpec((tb, In_p), lambda i, j: (i, 0)),          # streamed x tiles
        _weight_spec((In_p, H_p), lambda i, j: (0, 0), single_buffer_weights),
        _weight_spec((1, H_p), lambda i, j: (0, 0), single_buffer_weights),
        _weight_spec((H_p, tn), lambda i, j: (0, j), resident_w2),
        _weight_spec((1, tn), lambda i, j: (0, j), resident_w2),
    ]
    if use_chunked:
        kernel = partial(mlp_kernel_hchunk, h_chunk=h_chunk)
        scratch = [pltpu.VMEM((tb, tn), jnp.float32)]
    else:
        kernel = mlp_kernel
        scratch = []

    out_p = pl.pallas_call(
        kernel,
        out_shape=jax.ShapeDtypeStruct((B_p, C_p), out_dtype),
        grid_spec=pltpu.PrefetchScalarGridSpec(
            num_scalar_prefetch=0,
            grid=(B_p // tb, n_ctiles),
            in_specs=in_specs,
            out_specs=pl.BlockSpec((tb, tn), lambda i, j: (i, j)),
            scratch_shapes=scratch,
        ),
        compiler_params=pltpu.CompilerParams(
            dimension_semantics=("parallel", "parallel"),
            vmem_limit_bytes=vmem_limit,
        ),
        cost_estimate=cost,
    )(x_p, w1_p, b1_p, w2_p, b2_p)

    if B_p == B and C_p == C:
        return out_p                    # aligned case: no extra HBM copy
    return out_p[:B, :C]


_SINGLE_BUFFER_OK = True


def forward(x, params, **kwargs):
    """simple_nn_forward with a graceful fallback if this JAX build rejects
    pipeline_mode=pl.Buffered(1) for the resident weight blocks."""
    global _SINGLE_BUFFER_OK
    if _SINGLE_BUFFER_OK:
        try:
            return simple_nn_forward(x, *params, **kwargs)
        except Exception:
            _SINGLE_BUFFER_OK = False
    return simple_nn_forward(x, *params, single_buffer_weights=False, **kwargs)


def init_params(key, input_size, hidden_size, num_classes, dtype=jnp.float32):
    """Deterministic init mirroring nn.Linear's U(-1/sqrt(fan_in), 1/sqrt(fan_in))."""
    k1, k2, k3, k4 = jax.random.split(key, 4)
    bound1 = 1.0 / (input_size ** 0.5)
    bound2 = 1.0 / (hidden_size ** 0.5)
    # stored already transposed: [in, out]
    w1 = jax.random.uniform(k1, (input_size, hidden_size), dtype, -bound1, bound1)
    b1 = jax.random.uniform(k2, (hidden_size,), dtype, -bound1, bound1)
    w2 = jax.random.uniform(k3, (hidden_size, num_classes), dtype, -bound2, bound2)
    b2 = jax.random.uniform(k4, (num_classes,), dtype, -bound2, bound2)
    return w1, b1, w2, b2


if __name__ == "__main__":
    # ---- SimpleNN toy sizes ------------------------------------------------
    batch, input_size, hidden_size, num_classes = 8, 32, 64, 16
    key = jax.random.PRNGKey(0)
    kx, kp = jax.random.split(key)
    x = jax.random.normal(kx, (batch, input_size), dtype=jnp.float32)
    w1, b1, w2, b2 = init_params(kp, input_size, hidden_size, num_classes)
    ref = jnp.maximum(x @ w1 + b1, 0.0) @ w2 + b2        # plain-JAX f32 reference

    # (1) f32 compute path: tight correctness check of padding / tiling.
    p32 = prepare_params(w1, b1, w2, b2, compute_dtype=jnp.float32)
    out_f32 = jax.block_until_ready(forward(x, p32, num_classes=num_classes))
    assert out_f32.shape == (batch, num_classes)
    assert jnp.allclose(out_f32, ref, atol=1e-5, rtol=1e-5)

    # (2) default bf16 MXU path (params prepared once, reused across calls).
    p16 = prepare_params(w1, b1, w2, b2)
    out_bf16 = jax.block_until_ready(forward(x, p16, num_classes=num_classes))
    assert out_bf16.shape == (batch, num_classes)
    assert jnp.allclose(out_bf16, ref, atol=5e-2, rtol=5e-2)

    # (3) exercise the H-chunked accumulator and the C-tiled w2 fallback on a
    #     slightly larger (still small) config; f32 for tight tolerances.
    b2_, in2, hid2, cls2 = 16, 128, 256, 256
    kx2, kp2 = jax.random.split(jax.random.PRNGKey(1))
    x2 = jax.random.normal(kx2, (b2_, in2), dtype=jnp.float32)
    w1b, b1b, w2b, b2b = init_params(kp2, in2, hid2, cls2)
    ref2 = jnp.maximum(x2 @ w1b + b1b, 0.0) @ w2b + b2b
    q32 = prepare_params(w1b, b1b, w2b, b2b, compute_dtype=jnp.float32)
    out_hc = jax.block_until_ready(
        forward(x2, q32, num_classes=cls2, h_chunk=128))
    assert jnp.allclose(out_hc, ref2, atol=1e-4, rtol=1e-4)
    out_ct = jax.block_until_ready(
        forward(x2, q32, num_classes=cls2, h_chunk=128, max_tn=128))
    assert jnp.allclose(out_ct, ref2, atol=1e-4, rtol=1e-4)

    print("KERNEL_OK")
</pallas_src>

<mosaic_0001>
module attributes {stable_mosaic.version = 11 : i64} {
  func.func @mlp_kernel(%arg0: i32, %arg1: i32, %arg2: memref<8x128xf32, #tpu.memory_space<vmem>>, %arg3: memref<128x128xf32, #tpu.memory_space<vmem>>, %arg4: memref<1x128xf32, #tpu.memory_space<vmem>>, %arg5: memref<128x128xf32, #tpu.memory_space<vmem>>, %arg6: memref<1x128xf32, #tpu.memory_space<vmem>>, %arg7: memref<8x128xf32, #tpu.memory_space<vmem>>) attributes {dimension_semantics = [#tpu.dimension_semantics<parallel>, #tpu.dimension_semantics<parallel>], iteration_bounds = array<i64: 1, 1>, scalar_prefetch = 0 : i64, scratch_operands = 0 : i64, tpu.core_type = #tpu.core_type<tc>, window_params = [{transform_indices = @transform_0, window_bounds = array<i64: 8, 128>}, {pipeline_mode = #tpu.pipeline_mode<synchronous>, transform_indices = @transform_1, window_bounds = array<i64: 128, 128>}, {pipeline_mode = #tpu.pipeline_mode<synchronous>, transform_indices = @transform_2, window_bounds = array<i64: 1, 128>}, {pipeline_mode = #tpu.pipeline_mode<synchronous>, transform_indices = @transform_3, window_bounds = array<i64: 128, 128>}, {pipeline_mode = #tpu.pipeline_mode<synchronous>, transform_indices = @transform_4, window_bounds = array<i64: 1, 128>}, {transform_indices = @transform_5, window_bounds = array<i64: 8, 128>}]} {
    %c0 = arith.constant 0 : index
    %c0_0 = arith.constant 0 : index
    %0 = vector.load %arg2[%c0, %c0_0] : memref<8x128xf32, #tpu.memory_space<vmem>>, vector<8x128xf32>
    %c0_1 = arith.constant 0 : index
    %c0_2 = arith.constant 0 : index
    %1 = vector.load %arg3[%c0_1, %c0_2] : memref<128x128xf32, #tpu.memory_space<vmem>>, vector<128x128xf32>
    %cst = arith.constant dense<0.000000e+00> : vector<8x128xf32>
    %2 = tpu.matmul %0, %1, %cst {dimension_numbers = #tpu.dot_dimension_numbers<[1], [0], [0], [1], [0, 0, 1, 1], [], []>} : vector<8x128xf32>, vector<128x128xf32>, vector<8x128xf32> -> vector<8x128xf32>
    %c0_3 = arith.constant 0 : index
    %c0_4 = arith.constant 0 : index
    %3 = vector.load %arg4[%c0_3, %c0_4] : memref<1x128xf32, #tpu.memory_space<vmem>>, vector<1x128xf32>
    %4 = vector.broadcast %3 : vector<1x128xf32> to vector<8x128xf32>
    %5 = arith.addf %2, %4 : vector<8x128xf32>
    %cst_5 = arith.constant 0.000000e+00 : f32
    %6 = vector.broadcast %cst_5 : f32 to vector<8x128xf32>
    %7 = arith.maximumf %5, %6 : vector<8x128xf32>
    %c0_6 = arith.constant 0 : index
    %c0_7 = arith.constant 0 : index
    %8 = vector.load %arg5[%c0_6, %c0_7] : memref<128x128xf32, #tpu.memory_space<vmem>>, vector<128x128xf32>
    %cst_8 = arith.constant dense<0.000000e+00> : vector<8x128xf32>
    %9 = tpu.matmul %7, %8, %cst_8 {dimension_numbers = #tpu.dot_dimension_numbers<[1], [0], [0], [1], [0, 0, 1, 1], [], []>} : vector<8x128xf32>, vector<128x128xf32>, vector<8x128xf32> -> vector<8x128xf32>
    %c0_9 = arith.constant 0 : index
    %c0_10 = arith.constant 0 : index
    %10 = vector.load %arg6[%c0_9, %c0_10] : memref<1x128xf32, #tpu.memory_space<vmem>>, vector<1x128xf32>
    %11 = vector.broadcast %10 : vector<1x128xf32> to vector<8x128xf32>
    %12 = arith.addf %9, %11 : vector<8x128xf32>
    %c0_11 = arith.constant 0 : index
    %c0_12 = arith.constant 0 : index
    %13 = vector.load %arg7[%c0_11, %c0_12] : memref<8x128xf32, #tpu.memory_space<vmem>>, vector<8x128xf32>
    tpu.vector_store %arg7[%c0_11, %c0_12], %12 {strides = array<i32>} : memref<8x128xf32, #tpu.memory_space<vmem>>, vector<8x128xf32>,
    return
  }
  func.func @transform_0(%arg0: i32, %arg1: i32) -> (i32, i32) {
    %c0_i32 = arith.constant 0 : i32
    %c0_i32_0 = arith.constant 0 : i32
    return %arg0, %c0_i32 : i32, i32
  }
  func.func @transform_1(%arg0: i32, %arg1: i32) -> (i32, i32) {
    %c0_i32 = arith.constant 0 : i32
    %c0_i32_0 = arith.constant 0 : i32
    %c0_i32_1 = arith.constant 0 : i32
    return %c0_i32, %c0_i32_0 : i32, i32
  }
  func.func @transform_2(%arg0: i32, %arg1: i32) -> (i32, i32) {
    %c0_i32 = arith.constant 0 : i32
    %c0_i32_0 = arith.constant 0 : i32
    %c0_i32_1 = arith.constant 0 : i32
    return %c0_i32, %c0_i32_0 : i32, i32
  }
  func.func @transform_3(%arg0: i32, %arg1: i32) -> (i32, i32) {
    %c0_i32 = arith.constant 0 : i32
    %c0_i32_0 = arith.constant 0 : i32
    return %c0_i32, %arg1 : i32, i32
  }
  func.func @transform_4(%arg0: i32, %arg1: i32) -> (i32, i32) {
    %c0_i32 = arith.constant 0 : i32
    %c0_i32_0 = arith.constant 0 : i32
    return %c0_i32, %arg1 : i32, i32
  }
  func.func @transform_5(%arg0: i32, %arg1: i32) -> (i32, i32) {
    %c0_i32 = arith.constant 0 : i32
    return %arg0, %arg1 : i32, i32
  }
}

module attributes {stable_mosaic.version = 11 : i64} {
  func.func @mlp_kernel(%arg0: i32, %arg1: i32, %arg2: memref<8x128xf32, #tpu.memory_space<vmem>>, %arg3: memref<128x128xf32, #tpu.memory_space<vmem>>, %arg4: memref<1x128xf32, #tpu.memory_space<vmem>>, %arg5: memref<128x128xf32, #tpu.memory_space<vmem>>, %arg6: memref<1x128xf32, #tpu.memory_space<vmem>>, %arg7: memref<8x128xf32, #tpu.memory_space<vmem>>) attributes {dimension_semantics = [#tpu.dimension_semantics<parallel>, #tpu.dimension_semantics<parallel>], iteration_bounds = array<i64: 1, 1>, scalar_prefetch = 0 : i64, scratch_operands = 0 : i64, tpu.core_type = #tpu.core_type<tc>, window_params = [{transform_indices = @transform_0, window_bounds = array<i64: 8, 128>}, {pipeline_mode = #tpu.pipeline_mode<synchronous>, transform_indices = @transform_1, window_bounds = array<i64: 128, 128>}, {pipeline_mode = #tpu.pipeline_mode<synchronous>, transform_indices = @transform_2, window_bounds = array<i64: 1, 128>}, {transform_indices = @transform_3, window_bounds = array<i64: 128, 128>}, {transform_indices = @transform_4, window_bounds = array<i64: 1, 128>}, {transform_indices = @transform_5, window_bounds = array<i64: 8, 128>}]} {
    %c0 = arith.constant 0 : index
    %c0_0 = arith.constant 0 : index
    %0 = vector.load %arg2[%c0, %c0_0] : memref<8x128xf32, #tpu.memory_space<vmem>>, vector<8x128xf32>
    %c0_1 = arith.constant 0 : index
    %c0_2 = arith.constant 0 : index
    %1 = vector.load %arg3[%c0_1, %c0_2] : memref<128x128xf32, #tpu.memory_space<vmem>>, vector<128x128xf32>
    %cst = arith.constant dense<0.000000e+00> : vector<8x128xf32>
    %2 = tpu.matmul %0, %1, %cst {dimension_numbers = #tpu.dot_dimension_numbers<[1], [0], [0], [1], [0, 0, 1, 1], [], []>} : vector<8x128xf32>, vector<128x128xf32>, vector<8x128xf32> -> vector<8x128xf32>
    %c0_3 = arith.constant 0 : index
    %c0_4 = arith.constant 0 : index
    %3 = vector.load %arg4[%c0_3, %c0_4] : memref<1x128xf32, #tpu.memory_space<vmem>>, vector<1x128xf32>
    %4 = vector.broadcast %3 : vector<1x128xf32> to vector<8x128xf32>
    %5 = arith.addf %2, %4 : vector<8x128xf32>
    %cst_5 = arith.constant 0.000000e+00 : f32
    %6 = vector.broadcast %cst_5 : f32 to vector<8x128xf32>
    %7 = arith.maximumf %5, %6 : vector<8x128xf32>
    %c0_6 = arith.constant 0 : index
    %c0_7 = arith.constant 0 : index
    %8 = vector.load %arg5[%c0_6, %c0_7] : memref<128x128xf32, #tpu.memory_space<vmem>>, vector<128x128xf32>
    %cst_8 = arith.constant dense<0.000000e+00> : vector<8x128xf32>
    %9 = tpu.matmul %7, %8, %cst_8 {dimension_numbers = #tpu.dot_dimension_numbers<[1], [0], [0], [1], [0, 0, 1, 1], [], []>} : vector<8x128xf32>, vector<128x128xf32>, vector<8x128xf32> -> vector<8x128xf32>
    %c0_9 = arith.constant 0 : index
    %c0_10 = arith.constant 0 : index
    %10 = vector.load %arg6[%c0_9, %c0_10] : memref<1x128xf32, #tpu.memory_space<vmem>>, vector<1x128xf32>
    %11 = vector.broadcast %10 : vector<1x128xf32> to vector<8x128xf32>
    %12 = arith.addf %9, %11 : vector<8x128xf32>
    %c0_11 = arith.constant 0 : index
    %c0_12 = arith.constant 0 : index
    %13 = vector.load %arg7[%c0_11, %c0_12] : memref<8x128xf32, #tpu.memory_space<vmem>>, vector<8x128xf32>
    tpu.vector_store %arg7[%c0_11, %c0_12], %12 {strides = array<i32>} : memref<8x128xf32, #tpu.memory_space<vmem>>, vector<8x128xf32>,
    return
  }
  func.func @transform_0(%arg0: i32, %arg1: i32) -> (i32, i32) {
    %c0_i32 = arith.constant 0 : i32
    %c0_i32_0 = arith.constant 0 : i32
    return %arg0, %c0_i32 : i32, i32
  }
  func.func @transform_1(%arg0: i32, %arg1: i32) -> (i32, i32) {
    %c0_i32 = arith.constant 0 : i32
    %c0_i32_0 = arith.constant 0 : i32
    %c0_i32_1 = arith.constant 0 : i32
    return %c0_i32, %c0_i32_0 : i32, i32
  }
  func.func @transform_2(%arg0: i32, %arg1: i32) -> (i32, i32) {
    %c0_i32 = arith.constant 0 : i32
    %c0_i32_0 = arith.constant 0 : i32
    %c0_i32_1 = arith.constant 0 : i32
    return %c0_i32, %c0_i32_0 : i32, i32
  }
  func.func @transform_3(%arg0: i32, %arg1: i32) -> (i32, i32) {
    %c0_i32 = arith.constant 0 : i32
    %c0_i32_0 = arith.constant 0 : i32
    return %c0_i32, %arg1 : i32, i32
  }
  func.func @transform_4(%arg0: i32, %arg1: i32) -> (i32, i32) {
    %c0_i32 = arith.constant 0 : i32
    %c0_i32_0 = arith.constant 0 : i32
    return %c0_i32, %arg1 : i32, i32
  }
  func.func @transform_5(%arg0: i32, %arg1: i32) -> (i32, i32) {
    %c0_i32 = arith.constant 0 : i32
    return %arg0, %arg1 : i32, i32
  }
}

</mosaic_0001>

<bundles_post_ra>
// kernel: simple_nn_forward.1
= control target key start
LH: loop header
LB: loop body
LE: loop exit
PB: predicated region body
PF: predicated region fallthrough
CT: control target
= control target key end

     0   :  { %10 = vsyncpa [#allocation3], 0  ;;  %s522_s0 = inlined_call_operand.vmem [shape: f32[8,128], index: 0, kind: input, shape index: {}]   ;;  %s523_s1 = inlined_call_operand.hbm [shape: f32[128,128], index: 1, kind: input, shape index: {}]   ;;  %s524_s2 = inlined_call_operand.vmem [shape: f32[1,128], index: 2, kind: input, shape index: {}]   ;;  %s525_s3 = inlined_call_operand.hbm [shape: f32[128,128], index: 3, kind: input, shape index: {}]   ;;  %s526_s4 = inlined_call_operand.vmem [shape: f32[1,128], index: 4, kind: input, shape index: {}]   ;;  %s527_s5 = inlined_call_operand.hbm [shape: f32[8,128], index: 5, kind: output, shape index: {}]  }
   0x1   :  { %11 = vsyncpa [#allocation6], 0 }
   0x2   :  { %12 = vsyncpa [#allocation4], 0  ;;  %s433_s18 = smov [#allocation2]  }
   0x3   :  { %s20_s19 = sshll.u32 %s433_s18, 4  ;;  %s21_s19 = int_to_ptr.vmem [resolvable:$true] %s20_s19 }
   0x4   :  { %s375_s20 = scalar_lea.vmem %s21_s19, 2048  ;;  %p380_p1 = scmp.lt.s32.totalorder %s21_s19, %s21_s19 }
   0x5   :  { %p376_p0 = scmp.ne.s32.totalorder %s21_s19, %s375_s20  ;;  %p381_p2 = scmp.lt.s32.totalorder %s375_s20, %s375_s20 }
   0x7   :  { %p382_p3 = por %p381_p2, %p380_p1 }
   0x9   :  { %p383_p4 = pnand %p382_p3, %p376_p0 }
   0xb   :  { %386 = shalt.err (!%p383_p4)
}
   0xc   :  { %s434_s21 = smov 128   ;;  %s435_s22 = smov 8  }
   0xd   :  { %26 = dma.hbm_to_vmem [thread:$0]  %s523_s1, 2048, %s21_s19, [#allocation3], %s434_s21, %s434_s21, %s435_s22  }
   0xe   :  { %s436_s25 = smov [#allocation5]  }
   0xf   :  { %s34_s26 = sshll.u32 %s436_s25, 4  ;;  %s35_s26 = int_to_ptr.vmem [resolvable:$true] %s34_s26 }
  0x10   :  { %s395_s27 = scalar_lea.vmem %s35_s26, 2048  ;;  %p400_p6 = scmp.lt.s32.totalorder %s35_s26, %s35_s26 }
  0x11   :  { %p396_p5 = scmp.ne.s32.totalorder %s35_s26, %s395_s27  ;;  %p401_p7 = scmp.lt.s32.totalorder %s395_s27, %s395_s27 }
  0x13   :  { %p402_p8 = por %p401_p7, %p400_p6 }
  0x15   :  { %p403_p9 = pnand %p402_p8, %p396_p5 }
  0x17   :  { %406 = shalt.err (!%p403_p9)
}
  0x18   :  { %40 = dma.hbm_to_vmem [thread:$0]  %s525_s3, 2048, %s35_s26, [#allocation6], %s434_s21, %s434_s21, %s435_s22  }
  0x19   :  { %427 = dma.done.wait [#allocation3], 2048  }
  0x1a   :  { %428 = vsyncadd [#allocation3], 4294965248 }
  0x1b   :  { %429 = dma.done.wait [#allocation6], 2048  }
  0x1c   :  { %430 = vsyncadd [#allocation6], 4294965248  ;;  %v437_v0 = vmov 0.0   ;;  %vm438_vm0 = vmmov 0   ;;  %v65_v1 = vld [vmem:[#allocation2 + $0x78] sm:$0xff]  ;;  %v64_v2 = vld [vmem:[#allocation2 + $0x70] sm:$0xff] }
  0x1d   :  { %290 = vmatprep.subr.mxu0 %v437_v0  ;;  %322 = vmatprep.mubr.msk.f32.mxu0 %vm438_vm0, %v437_v0  ;;  %v63_v3 = vld [vmem:[#allocation2 + $0x68] sm:$0xff]  ;;  %v62_v4 = vld [vmem:[#allocation2 + $0x60] sm:$0xff]  ;;  %v159_v5 = vld [vmem:[#allocation5 + $0x78] sm:$0xff]  ;;  %s439_s8 = smov [#allocation7]  }
  0x1e   :  { %325 = vmatprep.subr.mxu1 %v437_v0  ;;  %357 = vmatprep.mubr.msk.f32.mxu1 %vm438_vm0, %v437_v0  ;;  %v61_v6 = vld [vmem:[#allocation2 + $0x58] sm:$0xff]  ;;  %v158_v7 = vld [vmem:[#allocation5 + $0x70] sm:$0xff]  ;;  %v157_v8 = vld [vmem:[#allocation5 + $0x68] sm:$0xff]  ;;  %s244_s9 = sshll.u32 %s439_s8, 4  ;;  %s245_s9 = int_to_ptr.vmem [resolvable:$true] %s244_s9 }
  0x1f   :  { %291 = vmatpush3.msra.mxu0 %v65_v1  ;;  %326 = vmatpush3.msra.mxu1 %v159_v5  ;;  %v60_v9 = vld [vmem:[#allocation2 + $0x50] sm:$0xff]  ;;  %v156_v10 = vld [vmem:[#allocation5 + $0x60] sm:$0xff]  ;;  %v59_v11 = vld [vmem:[#allocation2 + $0x48] sm:$0xff]  ;;  %s407_s10 = scalar_lea.vmem %s245_s9, 128  ;;  %p412_p11 = scmp.lt.s32.totalorder %s245_s9, %s245_s9 }
  0x20   :  { %292 = vmatprep.subr.mxu0 %v437_v0  ;;  %327 = vmatprep.subr.mxu1 %v437_v0  ;;  %v155_v12 = vld [vmem:[#allocation5 + $0x58] sm:$0xff]  ;;  %v58_v13 = vld [vmem:[#allocation2 + $0x40] sm:$0xff]  ;;  %v154_v14 = vld [vmem:[#allocation5 + $0x50] sm:$0xff]  ;;  %p408_p10 = scmp.ne.s32.totalorder %s245_s9, %s407_s10  ;;  %p413_p12 = scmp.lt.s32.totalorder %s407_s10, %s407_s10 }
  0x21   :  { %293 = vmatpush3.msra.mxu0 %v64_v2  ;;  %328 = vmatpush3.msra.mxu1 %v158_v7  ;;  %v57_v15 = vld [vmem:[#allocation2 + $0x38] sm:$0xff]  ;;  %v153_v16 = vld [vmem:[#allocation5 + $0x48] sm:$0xff]  ;;  %v56_v17 = vld [vmem:[#allocation2 + $0x30] sm:$0xff] }
  0x22   :  { %294 = vmatprep.subr.mxu0 %v437_v0  ;;  %329 = vmatprep.subr.mxu1 %v437_v0  ;;  %v152_v18 = vld [vmem:[#allocation5 + $0x40] sm:$0xff]  ;;  %v55_v19 = vld [vmem:[#allocation2 + $0x28] sm:$0xff]  ;;  %v151_v20 = vld [vmem:[#allocation5 + $0x38] sm:$0xff]  ;;  %p414_p13 = por %p413_p12, %p412_p11 }
  0x23   :  { %295 = vmatpush3.msra.mxu0 %v63_v3  ;;  %330 = vmatpush3.msra.mxu1 %v157_v8  ;;  %v54_v21 = vld [vmem:[#allocation2 + $0x20] sm:$0xff]  ;;  %v150_v22 = vld [vmem:[#allocation5 + $0x30] sm:$0xff]  ;;  %v53_v23 = vld [vmem:[#allocation2 + $0x18] sm:$0xff] }
  0x24   :  { %296 = vmatprep.subr.mxu0 %v437_v0  ;;  %331 = vmatprep.subr.mxu1 %v437_v0  ;;  %v149_v24 = vld [vmem:[#allocation5 + $0x28] sm:$0xff]  ;;  %v52_v25 = vld [vmem:[#allocation2 + $0x10] sm:$0xff]  ;;  %v148_v26 = vld [vmem:[#allocation5 + $0x20] sm:$0xff]  ;;  %p415_p0 = pnand %p414_p13, %p408_p10 }
  0x25   :  { %297 = vmatpush3.msra.mxu0 %v62_v4  ;;  %332 = vmatpush3.msra.mxu1 %v156_v10  ;;  %v51_v27 = vld [vmem:[#allocation2 + $0x8] sm:$0xff]  ;;  %v147_v28 = vld [vmem:[#allocation5 + $0x18] sm:$0xff]  ;;  %v50_v29 = vld [vmem:[#allocation2] sm:$0xff] }
  0x26   :  { %298 = vmatprep.subr.mxu0 %v437_v0  ;;  %333 = vmatprep.subr.mxu1 %v437_v0  ;;  %v49_v30 = vld [vmem:[%s522_s0] sm:$0xff]  ;;  %v146_v31 = vld [vmem:[#allocation5 + $0x10] sm:$0xff]  ;;  %v145_v32 = vld [vmem:[#allocation5 + $0x8] sm:$0xff] }
  0x27   :  { %299 = vmatpush3.msra.mxu0 %v61_v6  ;;  %334 = vmatpush3.msra.mxu1 %v155_v12  ;;  %v144_v33 = vld [vmem:[#allocation5] sm:$0xff] }
  0x28   :  { %300 = vmatprep.subr.mxu0 %v437_v0  ;;  %335 = vmatprep.subr.mxu1 %v437_v0  ;;  %v254_v34 = vld [vmem:[%s524_s2] ss:$0 sm:$0xff] }
  0x29   :  { %301 = vmatpush3.msra.mxu0 %v60_v9  ;;  %336 = vmatpush3.msra.mxu1 %v154_v14  ;;  %v255_v39 = vld [vmem:[%s526_s4] ss:$0 sm:$0xff] }
  0x2a   :  { %302 = vmatprep.subr.mxu0 %v437_v0  ;;  %337 = vmatprep.subr.mxu1 %v437_v0 }
  0x2b   :  { %303 = vmatpush3.msra.mxu0 %v59_v11  ;;  %338 = vmatpush3.msra.mxu1 %v153_v16 }
  0x2c   :  { %304 = vmatprep.subr.mxu0 %v437_v0  ;;  %339 = vmatprep.subr.mxu1 %v437_v0 }
  0x2d   :  { %305 = vmatpush3.msra.mxu0 %v58_v13  ;;  %340 = vmatpush3.msra.mxu1 %v152_v18 }
  0x2e   :  { %306 = vmatprep.subr.mxu0 %v437_v0  ;;  %341 = vmatprep.subr.mxu1 %v437_v0 }
  0x2f   :  { %307 = vmatpush3.msra.mxu0 %v57_v15  ;;  %342 = vmatpush3.msra.mxu1 %v151_v20 }
  0x30   :  { %308 = vmatprep.subr.mxu0 %v437_v0  ;;  %343 = vmatprep.subr.mxu1 %v437_v0 }
  0x31   :  { %309 = vmatpush3.msra.mxu0 %v56_v17  ;;  %344 = vmatpush3.msra.mxu1 %v150_v22 }
  0x32   :  { %310 = vmatprep.subr.mxu0 %v437_v0  ;;  %345 = vmatprep.subr.mxu1 %v437_v0 }
  0x33   :  { %311 = vmatpush3.msra.mxu0 %v55_v19  ;;  %346 = vmatpush3.msra.mxu1 %v149_v24 }
  0x34   :  { %312 = vmatprep.subr.mxu0 %v437_v0  ;;  %347 = vmatprep.subr.mxu1 %v437_v0 }
  0x35   :  { %313 = vmatpush3.msra.mxu0 %v54_v21  ;;  %348 = vmatpush3.msra.mxu1 %v148_v26 }
  0x36   :  { %314 = vmatprep.subr.mxu0 %v437_v0  ;;  %349 = vmatprep.subr.mxu1 %v437_v0 }
  0x37   :  { %315 = vmatpush3.msra.mxu0 %v53_v23  ;;  %350 = vmatpush3.msra.mxu1 %v147_v28 }
  0x38   :  { %316 = vmatprep.subr.mxu0 %v437_v0  ;;  %351 = vmatprep.subr.mxu1 %v437_v0 }
  0x39   :  { %317 = vmatpush3.msra.mxu0 %v52_v25  ;;  %352 = vmatpush3.msra.mxu1 %v146_v31 }
  0x3a   :  { %318 = vmatprep.subr.mxu0 %v437_v0  ;;  %353 = vmatprep.subr.mxu1 %v437_v0 }
  0x3b   :  { %319 = vmatpush3.msra.mxu0 %v51_v27  ;;  %354 = vmatpush3.msra.mxu1 %v145_v32 }
  0x3c   :  { %320 = vmatprep.subr.mxu0 %v437_v0  ;;  %355 = vmatprep.subr.mxu1 %v437_v0 }
  0x3d   :  { %321 = vmatpush3.msra.mxu0 %v50_v29  ;;  %356 = vmatpush3.msra.mxu1 %v144_v33 }
  0x3e   :  { %323 = vmatmul.mubr.f32.vlgmr.msra.gmra.mxu0 %v49_v30 }
  0xfe   :  { %v139_v35 = vpop.f32.mrf.mxu0 }
  0xff   :  { %v140_v36 = vadd.f32 %v254_v34, %v139_v35 }
 0x100   :  { %v324_v37 = vpop.f32.mrf.mxu0 }
 0x101   :  { %v143_v38 = vmax.f32 %v140_v36, 0.0 }
 0x103   :  { %358 = vmatmul.mubr.f32.vlgmr.msra.gmra.mxu1 %v143_v38 }
 0x1c3   :  { %v233_v40 = vpop.f32.mrf.mxu1 }
 0x1c4   :  { %v234_v41 = vadd.f32 %v255_v39, %v233_v40 }
 0x1c5   :  { %v359_v42 = vpop.f32.mrf.mxu1 }
 0x1c6   :  { %237 = vst [vmem:[#allocation7] sm:$0xff] %v234_v41 }
 0x1c7   :  { %418 = shalt.err (!%p415_p0)
}
 0x1c8   :  { %247 = dma.vmem_to_hbm [thread:$0]  %s245_s9, 128, %s527_s5, [#allocation4]  }
 0x1c9   :  { %431 = dma.done.wait [#allocation4], 128  }
 0x1ca   :  { %432 = vsyncadd [#allocation4], 4294967168 }
 0x1cb   :  { %251 = vsyncpa [#allocation3], 1 }
 0x1cc   :  { %252 = vsyncpa [#allocation6], 1 }
 0x1cd   :  { %253 = vsyncpa [#allocation4], 1 }

// kernel: simple_nn_forward.1
= control target key start
LH: loop header
LB: loop body
LE: loop exit
PB: predicated region body
PF: predicated region fallthrough
CT: control target
= control target key end

     0   :  { %10 = vsyncpa [#allocation3], 0  ;;  %s522_s0 = inlined_call_operand.vmem [shape: f32[8,128], index: 0, kind: input, shape index: {}]   ;;  %s523_s1 = inlined_call_operand.hbm [shape: f32[128,128], index: 1, kind: input, shape index: {}]   ;;  %s524_s2 = inlined_call_operand.vmem [shape: f32[1,128], index: 2, kind: input, shape index: {}]   ;;  %s525_s3 = inlined_call_operand.hbm [shape: f32[128,128], index: 3, kind: input, shape index: {}]   ;;  %s526_s4 = inlined_call_operand.vmem [shape: f32[1,128], index: 4, kind: input, shape index: {}]   ;;  %s527_s5 = inlined_call_operand.hbm [shape: f32[8,128], index: 5, kind: output, shape index: {}]  }
   0x1   :  { %11 = vsyncpa [#allocation6], 0 }
   0x2   :  { %12 = vsyncpa [#allocation4], 0  ;;  %s433_s18 = smov [#allocation2]  }
   0x3   :  { %s20_s19 = sshll.u32 %s433_s18, 4  ;;  %s21_s19 = int_to_ptr.vmem [resolvable:$true] %s20_s19 }
   0x4   :  { %s375_s20 = scalar_lea.vmem %s21_s19, 2048  ;;  %p380_p1 = scmp.lt.s32.totalorder %s21_s19, %s21_s19 }
   0x5   :  { %p376_p0 = scmp.ne.s32.totalorder %s21_s19, %s375_s20  ;;  %p381_p2 = scmp.lt.s32.totalorder %s375_s20, %s375_s20 }
   0x7   :  { %p382_p3 = por %p381_p2, %p380_p1 }
   0x9   :  { %p383_p4 = pnand %p382_p3, %p376_p0 }
   0xb   :  { %386 = shalt.err (!%p383_p4)
}
   0xc   :  { %s434_s21 = smov 128   ;;  %s435_s22 = smov 8  }
   0xd   :  { %26 = dma.hbm_to_vmem [thread:$0]  %s523_s1, 2048, %s21_s19, [#allocation3], %s434_s21, %s434_s21, %s435_s22  }
   0xe   :  { %s436_s25 = smov [#allocation5]  }
   0xf   :  { %s34_s26 = sshll.u32 %s436_s25, 4  ;;  %s35_s26 = int_to_ptr.vmem [resolvable:$true] %s34_s26 }
  0x10   :  { %s395_s27 = scalar_lea.vmem %s35_s26, 2048  ;;  %p400_p6 = scmp.lt.s32.totalorder %s35_s26, %s35_s26 }
  0x11   :  { %p396_p5 = scmp.ne.s32.totalorder %s35_s26, %s395_s27  ;;  %p401_p7 = scmp.lt.s32.totalorder %s395_s27, %s395_s27 }
  0x13   :  { %p402_p8 = por %p401_p7, %p400_p6 }
  0x15   :  { %p403_p9 = pnand %p402_p8, %p396_p5 }
  0x17   :  { %406 = shalt.err (!%p403_p9)
}
  0x18   :  { %40 = dma.hbm_to_vmem [thread:$0]  %s525_s3, 2048, %s35_s26, [#allocation6], %s434_s21, %s434_s21, %s435_s22  }
  0x19   :  { %427 = dma.done.wait [#allocation3], 2048  }
  0x1a   :  { %428 = vsyncadd [#allocation3], 4294965248 }
  0x1b   :  { %429 = dma.done.wait [#allocation6], 2048  }
  0x1c   :  { %430 = vsyncadd [#allocation6], 4294965248  ;;  %v437_v0 = vmov 0.0   ;;  %vm438_vm0 = vmmov 0   ;;  %v65_v1 = vld [vmem:[#allocation2 + $0x78] sm:$0xff]  ;;  %v64_v2 = vld [vmem:[#allocation2 + $0x70] sm:$0xff] }
  0x1d   :  { %290 = vmatprep.subr.mxu0 %v437_v0  ;;  %322 = vmatprep.mubr.msk.f32.mxu0 %vm438_vm0, %v437_v0  ;;  %v63_v3 = vld [vmem:[#allocation2 + $0x68] sm:$0xff]  ;;  %v62_v4 = vld [vmem:[#allocation2 + $0x60] sm:$0xff]  ;;  %v159_v5 = vld [vmem:[#allocation5 + $0x78] sm:$0xff]  ;;  %s439_s8 = smov [#allocation7]  }
  0x1e   :  { %325 = vmatprep.subr.mxu1 %v437_v0  ;;  %357 = vmatprep.mubr.msk.f32.mxu1 %vm438_vm0, %v437_v0  ;;  %v61_v6 = vld [vmem:[#allocation2 + $0x58] sm:$0xff]  ;;  %v158_v7 = vld [vmem:[#allocation5 + $0x70] sm:$0xff]  ;;  %v157_v8 = vld [vmem:[#allocation5 + $0x68] sm:$0xff]  ;;  %s244_s9 = sshll.u32 %s439_s8, 4  ;;  %s245_s9 = int_to_ptr.vmem [resolvable:$true] %s244_s9 }
  0x1f   :  { %291 = vmatpush3.msra.mxu0 %v65_v1  ;;  %326 = vmatpush3.msra.mxu1 %v159_v5  ;;  %v60_v9 = vld [vmem:[#allocation2 + $0x50] sm:$0xff]  ;;  %v156_v10 = vld [vmem:[#allocation5 + $0x60] sm:$0xff]  ;;  %v59_v11 = vld [vmem:[#allocation2 + $0x48] sm:$0xff]  ;;  %s407_s10 = scalar_lea.vmem %s245_s9, 128  ;;  %p412_p11 = scmp.lt.s32.totalorder %s245_s9, %s245_s9 }
  0x20   :  { %292 = vmatprep.subr.mxu0 %v437_v0  ;;  %327 = vmatprep.subr.mxu1 %v437_v0  ;;  %v155_v12 = vld [vmem:[#allocation5 + $0x58] sm:$0xff]  ;;  %v58_v13 = vld [vmem:[#allocation2 + $0x40] sm:$0xff]  ;;  %v154_v14 = vld [vmem:[#allocation5 + $0x50] sm:$0xff]  ;;  %p408_p10 = scmp.ne.s32.totalorder %s245_s9, %s407_s10  ;;  %p413_p12 = scmp.lt.s32.totalorder %s407_s10, %s407_s10 }
  0x21   :  { %293 = vmatpush3.msra.mxu0 %v64_v2  ;;  %328 = vmatpush3.msra.mxu1 %v158_v7  ;;  %v57_v15 = vld [vmem:[#allocation2 + $0x38] sm:$0xff]  ;;  %v153_v16 = vld [vmem:[#allocation5 + $0x48] sm:$0xff]  ;;  %v56_v17 = vld [vmem:[#allocation2 + $0x30] sm:$0xff] }
  0x22   :  { %294 = vmatprep.subr.mxu0 %v437_v0  ;;  %329 = vmatprep.subr.mxu1 %v437_v0  ;;  %v152_v18 = vld [vmem:[#allocation5 + $0x40] sm:$0xff]  ;;  %v55_v19 = vld [vmem:[#allocation2 + $0x28] sm:$0xff]  ;;  %v151_v20 = vld [vmem:[#allocation5 + $0x38] sm:$0xff]  ;;  %p414_p13 = por %p413_p12, %p412_p11 }
  0x23   :  { %295 = vmatpush3.msra.mxu0 %v63_v3  ;;  %330 = vmatpush3.msra.mxu1 %v157_v8  ;;  %v54_v21 = vld [vmem:[#allocation2 + $0x20] sm:$0xff]  ;;  %v150_v22 = vld [vmem:[#allocation5 + $0x30] sm:$0xff]  ;;  %v53_v23 = vld [vmem:[#allocation2 + $0x18] sm:$0xff] }
  0x24   :  { %296 = vmatprep.subr.mxu0 %v437_v0  ;;  %331 = vmatprep.subr.mxu1 %v437_v0  ;;  %v149_v24 = vld [vmem:[#allocation5 + $0x28] sm:$0xff]  ;;  %v52_v25 = vld [vmem:[#allocation2 + $0x10] sm:$0xff]  ;;  %v148_v26 = vld [vmem:[#allocation5 + $0x20] sm:$0xff]  ;;  %p415_p0 = pnand %p414_p13, %p408_p10 }
  0x25   :  { %297 = vmatpush3.msra.mxu0 %v62_v4  ;;  %332 = vmatpush3.msra.mxu1 %v156_v10  ;;  %v51_v27 = vld [vmem:[#allocation2 + $0x8] sm:$0xff]  ;;  %v147_v28 = vld [vmem:[#allocation5 + $0x18] sm:$0xff]  ;;  %v50_v29 = vld [vmem:[#allocation2] sm:$0xff] }
  0x26   :  { %298 = vmatprep.subr.mxu0 %v437_v0  ;;  %333 = vmatprep.subr.mxu1 %v437_v0  ;;  %v49_v30 = vld [vmem:[%s522_s0] sm:$0xff]  ;;  %v146_v31 = vld [vmem:[#allocation5 + $0x10] sm:$0xff]  ;;  %v145_v32 = vld [vmem:[#allocation5 + $0x8] sm:$0xff] }
  0x27   :  { %299 = vmatpush3.msra.mxu0 %v61_v6  ;;  %334 = vmatpush3.msra.mxu1 %v155_v12  ;;  %v144_v33 = vld [vmem:[#allocation5] sm:$0xff] }
  0x28   :  { %300 = vmatprep.subr.mxu0 %v437_v0  ;;  %335 = vmatprep.subr.mxu1 %v437_v0  ;;  %v254_v34 = vld [vmem:[%s524_s2] ss:$0 sm:$0xff] }
  0x29   :  { %301 = vmatpush3.msra.mxu0 %v60_v9  ;;  %336 = vmatpush3.msra.mxu1 %v154_v14  ;;  %v255_v39 = vld [vmem:[%s526_s4] ss:$0 sm:$0xff] }
  0x2a   :  { %302 = vmatprep.subr.mxu0 %v437_v0  ;;  %337 = vmatprep.subr.mxu1 %v437_v0 }
  0x2b   :  { %303 = vmatpush3.msra.mxu0 %v59_v11  ;;  %338 = vmatpush3.msra.mxu1 %v153_v16 }
  0x2c   :  { %304 = vmatprep.subr.mxu0 %v437_v0  ;;  %339 = vmatprep.subr.mxu1 %v437_v0 }
  0x2d   :  { %305 = vmatpush3.msra.mxu0 %v58_v13  ;;  %340 = vmatpush3.msra.mxu1 %v152_v18 }
  0x2e   :  { %306 = vmatprep.subr.mxu0 %v437_v0  ;;  %341 = vmatprep.subr.mxu1 %v437_v0 }
  0x2f   :  { %307 = vmatpush3.msra.mxu0 %v57_v15  ;;  %342 = vmatpush3.msra.mxu1 %v151_v20 }
  0x30   :  { %308 = vmatprep.subr.mxu0 %v437_v0  ;;  %343 = vmatprep.subr.mxu1 %v437_v0 }
  0x31   :  { %309 = vmatpush3.msra.mxu0 %v56_v17  ;;  %344 = vmatpush3.msra.mxu1 %v150_v22 }
  0x32   :  { %310 = vmatprep.subr.mxu0 %v437_v0  ;;  %345 = vmatprep.subr.mxu1 %v437_v0 }
  0x33   :  { %311 = vmatpush3.msra.mxu0 %v55_v19  ;;  %346 = vmatpush3.msra.mxu1 %v149_v24 }
  0x34   :  { %312 = vmatprep.subr.mxu0 %v437_v0  ;;  %347 = vmatprep.subr.mxu1 %v437_v0 }
  0x35   :  { %313 = vmatpush3.msra.mxu0 %v54_v21  ;;  %348 = vmatpush3.msra.mxu1 %v148_v26 }
  0x36   :  { %314 = vmatprep.subr.mxu0 %v437_v0  ;;  %349 = vmatprep.subr.mxu1 %v437_v0 }
  0x37   :  { %315 = vmatpush3.msra.mxu0 %v53_v23  ;;  %350 = vmatpush3.msra.mxu1 %v147_v28 }
  0x38   :  { %316 = vmatprep.subr.mxu0 %v437_v0  ;;  %351 = vmatprep.subr.mxu1 %v437_v0 }
  0x39   :  { %317 = vmatpush3.msra.mxu0 %v52_v25  ;;  %352 = vmatpush3.msra.mxu1 %v146_v31 }
  0x3a   :  { %318 = vmatprep.subr.mxu0 %v437_v0  ;;  %353 = vmatprep.subr.mxu1 %v437_v0 }
  0x3b   :  { %319 = vmatpush3.msra.mxu0 %v51_v27  ;;  %354 = vmatpush3.msra.mxu1 %v145_v32 }
  0x3c   :  { %320 = vmatprep.subr.mxu0 %v437_v0  ;;  %355 = vmatprep.subr.mxu1 %v437_v0 }
  0x3d   :  { %321 = vmatpush3.msra.mxu0 %v50_v29  ;;  %356 = vmatpush3.msra.mxu1 %v144_v33 }
  0x3e   :  { %323 = vmatmul.mubr.f32.vlgmr.msra.gmra.mxu0 %v49_v30 }
  0xfe   :  { %v139_v35 = vpop.f32.mrf.mxu0 }
  0xff   :  { %v140_v36 = vadd.f32 %v254_v34, %v139_v35 }
 0x100   :  { %v324_v37 = vpop.f32.mrf.mxu0 }
 0x101   :  { %v143_v38 = vmax.f32 %v140_v36, 0.0 }
 0x103   :  { %358 = vmatmul.mubr.f32.vlgmr.msra.gmra.mxu1 %v143_v38 }
 0x1c3   :  { %v233_v40 = vpop.f32.mrf.mxu1 }
 0x1c4   :  { %v234_v41 = vadd.f32 %v255_v39, %v233_v40 }
 0x1c5   :  { %v359_v42 = vpop.f32.mrf.mxu1 }
 0x1c6   :  { %237 = vst [vmem:[#allocation7] sm:$0xff] %v234_v41 }
 0x1c7   :  { %418 = shalt.err (!%p415_p0)
}
 0x1c8   :  { %247 = dma.vmem_to_hbm [thread:$0]  %s245_s9, 128, %s527_s5, [#allocation4]  }
 0x1c9   :  { %431 = dma.done.wait [#allocation4], 128  }
 0x1ca   :  { %432 = vsyncadd [#allocation4], 4294967168 }
 0x1cb   :  { %251 = vsyncpa [#allocation3], 1 }
 0x1cc   :  { %252 = vsyncpa [#allocation6], 1 }
 0x1cd   :  { %253 = vsyncpa [#allocation4], 1 }

</bundles_post_ra>
